<compile_context>
chip_gen: v7x
topology: tpu7x:2x2x1
jax: 0.10.0
libtpu: 0.0.40
codegen_flags: <defaults>
</compile_context>

<pallas_src>
import functools

import jax
import jax.numpy as jnp
from jax.experimental import pallas as pl
from jax.experimental.pallas import tpu as pltpu

P = 10  # exponent of the Lp loss (module default)

_SUBLANE = 8
_LANE = 128
_DEFAULT_BLOCK_ROWS = 8192  # 8192 x 128 x 4B = 4 MiB per block per input (f32)


def _detect_num_tensorcores():
    """Best-effort TensorCores-per-chip: 2 on v7x, 1 on v5e/v6e (and fallback)."""
    try:
        ver = str(getattr(pltpu.get_tpu_info(), "chip_version", "")).lower()
        if ver:
            return 2 if "7" in ver else 1
    except Exception:
        pass
    try:
        kind = jax.devices()[0].device_kind.lower().replace(" ", "")
        if "v7" in kind or "tpu7" in kind:
            return 2
    except Exception:
        pass
    return 1


def _lploss_kernel(x_ref, y_ref, o_ref, acc_ref, *,
                   block_rows, acc_rows, blocks_per_core, valid_rows, need_mask):
    c = pl.program_id(0)   # "parallel" core-split axis (size 1 on v5e/v6e)
    i = pl.program_id(1)   # "arbitrary" reduction axis

    @pl.when(i == 0)
    def _init():
        acc_ref[...] = jnp.zeros_like(acc_ref)

    # bf16 inputs: subtract in bf16, cast once (bf16 VALU on v6e/v7x); else f32.
    if x_ref.dtype == jnp.bfloat16 and y_ref.dtype == jnp.bfloat16:
        d = (x_ref[...] - y_ref[...]).astype(jnp.float32)
    else:
        d = x_ref[...].astype(jnp.float32) - y_ref[...].astype(jnp.float32)

    # p = 10 is even -> |d|^10 == d^10; keep it on the VALU as a squaring chain.
    d2 = d * d
    d4 = d2 * d2
    d8 = d4 * d4
    d10 = d8 * d2

    def _accumulate(v):
        # Up to (64,128): 8 independent vreg add chains instead of one deep
        # chain into a single (8,128) vreg.  Pure VPU adds, no lane movement.
        acc_ref[...] += jnp.sum(
            v.reshape(block_rows // acc_rows, acc_rows, _LANE), axis=0)

    if need_mask:
        blk = c * blocks_per_core + i          # un-clamped logical block index
        row0 = blk * block_rows
        is_interior = row0 + block_rows <= valid_rows

        @pl.when(is_interior)
        def _fast():
            _accumulate(d10)

        @pl.when(jnp.logical_not(is_interior))
        def _boundary():
            # Boundary block (partial rows) or clamped duplicate block (all
            # rows past the end): select-zero any garbage / duplicated rows.
            rows = row0 + jax.lax.broadcasted_iota(jnp.int32, d10.shape, 0)
            _accumulate(jnp.where(rows < valid_rows, d10, 0.0))
    else:
        _accumulate(d10)

    @pl.when(i == pl.num_programs(1) - 1)
    def _fin():
        # Single cross-lane / cross-sublane reduce per core.
        o_ref[...] = jnp.sum(acc_ref[...]).reshape(1, 1)


def lp_loss(inp, target, *, block_rows=_DEFAULT_BLOCK_ROWS, num_cores=None):
    """Pallas implementation of LpLoss(p=10).forward(input, target)."""
    assert inp.shape == target.shape, "input/target shapes must match"

    total = inp.size
    xf = inp.reshape(-1)
    yf = target.reshape(-1)

    pad_unit = _SUBLANE * _LANE  # 1024
    prefix = (total // pad_unit) * pad_unit
    tail = total - prefix

    # Ragged tail (< 1024 elements): tiny wrapper-side jnp sum instead of a
    # full-array jnp.pad copy.
    if tail:
        dt = xf[prefix:].astype(jnp.float32) - yf[prefix:].astype(jnp.float32)
        t2 = dt * dt
        t4 = t2 * t2
        t8 = t4 * t4
        tail_sum = jnp.sum(t8 * t2)
    else:
        tail_sum = jnp.float32(0.0)

    if prefix == 0:
        # Entire input smaller than one vreg tile: wrapper only.
        return tail_sum ** (1.0 / P)

    rows = prefix // _LANE                       # multiple of 8
    x2 = (xf[:prefix] if tail else xf).reshape(rows, _LANE)
    y2 = (yf[:prefix] if tail else yf).reshape(rows, _LANE)

    if num_cores is None:
        num_cores = _detect_num_tensorcores()
    num_cores = max(1, int(num_cores))

    block_rows = min(int(block_rows), rows)
    block_rows = max(_SUBLANE, (block_rows // _SUBLANE) * _SUBLANE)

    # Widened accumulator rows: largest divisor of block_rows that is a
    # multiple of 8 and <= 64.
    acc_rows = _SUBLANE
    r = min(64, block_rows)
    while r >= _SUBLANE:
        if block_rows % r == 0:
            acc_rows = r
            break
        r -= _SUBLANE

    blocks_total = pl.cdiv(rows, block_rows)
    blocks_per_core = pl.cdiv(blocks_total, num_cores)
    need_mask = (num_cores * blocks_per_core * block_rows) != rows

    def in_map(c, i):
        blk = c * blocks_per_core + i
        # Clamp so the DMA never targets a block fully past the array; the
        # kernel-side boundary branch zeroes any duplicated / partial rows.
        return (jnp.minimum(blk, blocks_total - 1), 0)

    kernel = functools.partial(
        _lploss_kernel,
        block_rows=block_rows,
        acc_rows=acc_rows,
        blocks_per_core=blocks_per_core,
        valid_rows=rows,
        need_mask=need_mask,
    )

    bytes_per_elem = (jnp.dtype(inp.dtype).itemsize
                      + jnp.dtype(target.dtype).itemsize)
    cost = pl.CostEstimate(
        flops=6 * prefix,
        transcendentals=0,
        bytes_accessed=prefix * bytes_per_elem + num_cores * 4,
    )

    partials = pl.pallas_call(
        kernel,
        out_shape=jax.ShapeDtypeStruct((num_cores, 1), jnp.float32),
        grid_spec=pltpu.PrefetchScalarGridSpec(
            num_scalar_prefetch=0,
            grid=(num_cores, blocks_per_core),
            in_specs=[
                pl.BlockSpec((block_rows, _LANE), in_map),
                pl.BlockSpec((block_rows, _LANE), in_map),
            ],
            out_specs=pl.BlockSpec((1, 1), lambda c, i: (c, 0)),
            scratch_shapes=[pltpu.VMEM((acc_rows, _LANE), jnp.float32)],
        ),
        compiler_params=pltpu.CompilerParams(
            # TODO(synk): on v7x, verify the leading axis actually shards
            # across the 2 TensorCores; switch to pltpu.CORE_PARALLEL if not.
            dimension_semantics=("parallel", "arbitrary"),
        ),
        cost_estimate=cost,
    )(x2, y2)

    # Sum per-core partials + ragged tail, then apply the p-th root.
    return (jnp.sum(partials) + tail_sum) ** (1.0 / P)


def _reference(x, y):
    return jnp.sum(jnp.abs(x - y) ** P) ** (1.0 / P)


if __name__ == "__main__":
    key = jax.random.PRNGKey(0)
    k1, k2, k3, k4, k5, k6 = jax.random.split(key, 6)

    # 1) Small NCHW reconstruction-loss shape (single block).
    x = jax.random.normal(k1, (2, 4, 16, 16), dtype=jnp.float32)
    y = jax.random.normal(k2, (2, 4, 16, 16), dtype=jnp.float32)
    loss = jax.block_until_ready(lp_loss(x, y))
    ref = _reference(x, y)
    assert jnp.allclose(loss, ref, rtol=1e-4, atol=1e-6), (loss, ref)

    # 2) Multi-block accumulation path (small block override, no mask needed).
    x2 = jax.random.normal(k3, (2, 4, 32, 32), dtype=jnp.float32)
    y2 = jax.random.normal(k4, (2, 4, 32, 32), dtype=jnp.float32)
    loss2 = jax.block_until_ready(lp_loss(x2, y2, block_rows=16))
    ref2 = _reference(x2, y2)
    assert jnp.allclose(loss2, ref2, rtol=1e-4, atol=1e-6), (loss2, ref2)

    # 3) Forced core-split + non-dividing block size -> exercises the boundary
    #    mask branch and the clamped duplicate block (works on any chip).
    loss2b = jax.block_until_ready(lp_loss(x2, y2, block_rows=24, num_cores=2))
    assert jnp.allclose(loss2b, ref2, rtol=1e-4, atol=1e-6), (loss2b, ref2)

    # 4) Size not a multiple of 1024 -> prefix kernel + wrapper-tail path
    #    (no jnp.pad copy).
    x3 = jax.random.normal(k5, (2, 3, 16, 16), dtype=jnp.float32)
    y3 = jax.random.normal(k6, (2, 3, 16, 16), dtype=jnp.float32)
    loss3 = jax.block_until_ready(lp_loss(x3, y3))
    ref3 = _reference(x3, y3)
    assert jnp.allclose(loss3, ref3, rtol=1e-4, atol=1e-6), (loss3, ref3)

    print("KERNEL_OK")
</pallas_src>

<mosaic_0001>
module attributes {stable_mosaic.version = 11 : i64} {
  func.func @_lploss_kernel(%arg0: i32, %arg1: i32, %arg2: memref<16x128xf32, #tpu.memory_space<vmem>>, %arg3: memref<16x128xf32, #tpu.memory_space<vmem>>, %arg4: memref<1x1xf32, #tpu.memory_space<vmem>>, %arg5: memref<16x128xf32, #tpu.memory_space<vmem>>) attributes {dimension_semantics = [#tpu.dimension_semantics<parallel>, #tpu.dimension_semantics<arbitrary>], iteration_bounds = array<i64: 1, 1>, scalar_prefetch = 0 : i64, scratch_operands = 1 : i64, tpu.core_type = #tpu.core_type<tc>, window_params = [{transform_indices = @transform_0, window_bounds = array<i64: 16, 128>}, {transform_indices = @transform_1, window_bounds = array<i64: 16, 128>}, {transform_indices = @transform_2, window_bounds = array<i64: 1, 1>}]} {
    %c0_i32 = arith.constant 0 : i32
    %0 = arith.cmpi eq, %arg1, %c0_i32 : i32
    %1 = arith.extui %0 : i1 to i32
    %c0_i32_0 = arith.constant 0 : i32
    %2 = arith.cmpi ne, %1, %c0_i32_0 : i32
    scf.if %2 {
      %cst_10 = arith.constant 0.000000e+00 : f32
      %18 = vector.broadcast %cst_10 : f32 to vector<16x128xf32>
      %c0_11 = arith.constant 0 : index
      %c0_12 = arith.constant 0 : index
      %19 = vector.load %arg5[%c0_11, %c0_12] : memref<16x128xf32, #tpu.memory_space<vmem>>, vector<16x128xf32>
      tpu.vector_store %arg5[%c0_11, %c0_12], %18 {strides = array<i32>} : memref<16x128xf32, #tpu.memory_space<vmem>>, vector<16x128xf32>,
    } else {
    }
    %c0 = arith.constant 0 : index
    %c0_1 = arith.constant 0 : index
    %3 = vector.load %arg2[%c0, %c0_1] : memref<16x128xf32, #tpu.memory_space<vmem>>, vector<16x128xf32>
    %c0_2 = arith.constant 0 : index
    %c0_3 = arith.constant 0 : index
    %4 = vector.load %arg3[%c0_2, %c0_3] : memref<16x128xf32, #tpu.memory_space<vmem>>, vector<16x128xf32>
    %5 = arith.subf %3, %4 : vector<16x128xf32>
    %6 = arith.mulf %5, %5 : vector<16x128xf32>
    %7 = arith.mulf %6, %6 : vector<16x128xf32>
    %8 = arith.mulf %7, %7 : vector<16x128xf32>
    %9 = arith.mulf %8, %6 : vector<16x128xf32>
    %c0_4 = arith.constant 0 : index
    %c0_5 = arith.constant 0 : index
    %10 = vector.load %arg5[%c0_4, %c0_5] : memref<16x128xf32, #tpu.memory_space<vmem>>, vector<16x128xf32>
    %11 = vector.shape_cast %9 : vector<16x128xf32> to vector<1x16x128xf32>
    %cst = arith.constant dense<0.000000e+00> : vector<16x128xf32>
    %12 = vector.multi_reduction <add>, %11, %cst [0] : vector<1x16x128xf32> to vector<16x128xf32>
    %13 = arith.addf %10, %12 : vector<16x128xf32>
    %c0_6 = arith.constant 0 : index
    %c0_7 = arith.constant 0 : index
    %14 = vector.load %arg5[%c0_6, %c0_7] : memref<16x128xf32, #tpu.memory_space<vmem>>, vector<16x128xf32>
    tpu.vector_store %arg5[%c0_6, %c0_7], %13 {strides = array<i32>} : memref<16x128xf32, #tpu.memory_space<vmem>>, vector<16x128xf32>,
    %c0_i32_8 = arith.constant 0 : i32
    %15 = arith.cmpi eq, %arg1, %c0_i32_8 : i32
    %16 = arith.extui %15 : i1 to i32
    %c0_i32_9 = arith.constant 0 : i32
    %17 = arith.cmpi ne, %16, %c0_i32_9 : i32
    scf.if %17 {
      %c0_10 = arith.constant 0 : index
      %c0_11 = arith.constant 0 : index
      %18 = vector.load %arg5[%c0_10, %c0_11] : memref<16x128xf32, #tpu.memory_space<vmem>>, vector<16x128xf32>
      %19 = vector.shape_cast %18 : vector<16x128xf32> to vector<1x16x128xf32>
      %cst_12 = arith.constant dense<0.000000e+00> : vector<1xf32>
      %20 = vector.multi_reduction <add>, %19, %cst_12 [1, 2] : vector<1x16x128xf32> to vector<1xf32>
      %21 = vector.shape_cast %20 : vector<1xf32> to vector<1x1x1xf32>
      %22 = vector.extract %21[0, 0, 0] : f32 from vector<1x1x1xf32>
      %23 = vector.broadcast %22 : f32 to vector<1x1xf32>
      %c0_13 = arith.constant 0 : index
      %c0_14 = arith.constant 0 : index
      %24 = vector.load %arg4[%c0_13, %c0_14] : memref<1x1xf32, #tpu.memory_space<vmem>>, vector<1x1xf32>
      tpu.vector_store %arg4[%c0_13, %c0_14], %23 {strides = array<i32>} : memref<1x1xf32, #tpu.memory_space<vmem>>, vector<1x1xf32>,
    } else {
    }
    return
  }
  func.func @transform_0(%arg0: i32, %arg1: i32) -> (i32, i32) {
    %c1_i32 = arith.constant 1 : i32
    %0 = arith.muli %arg0, %c1_i32 : i32
    %1 = arith.addi %0, %arg1 : i32
    %c0_i32 = arith.constant 0 : i32
    %2 = arith.minsi %1, %c0_i32 : i32
    %c0_i32_0 = arith.constant 0 : i32
    %c0_i32_1 = arith.constant 0 : i32
    return %2, %c0_i32_0 : i32, i32
  }
  func.func @transform_1(%arg0: i32, %arg1: i32) -> (i32, i32) {
    %c1_i32 = arith.constant 1 : i32
    %0 = arith.muli %arg0, %c1_i32 : i32
    %1 = arith.addi %0, %arg1 : i32
    %c0_i32 = arith.constant 0 : i32
    %2 = arith.minsi %1, %c0_i32 : i32
    %c0_i32_0 = arith.constant 0 : i32
    %c0_i32_1 = arith.constant 0 : i32
    return %2, %c0_i32_0 : i32, i32
  }
  func.func @transform_2(%arg0: i32, %arg1: i32) -> (i32, i32) {
    %c0_i32 = arith.constant 0 : i32
    %c0_i32_0 = arith.constant 0 : i32
    return %arg0, %c0_i32 : i32, i32
  }
}

</mosaic_0001>

<bundles_post_ra>
// kernel: tpu_custom_call.1
= control target key start
LH: loop header
LB: loop body
LE: loop exit
PB: predicated region body
PF: predicated region fallthrough
CT: control target
= control target key end

     0   :  { %7 = vsyncpa [#allocation4], 0  ;;  %s261_s0 = inlined_call_operand.hbm [shape: f32[16,128], index: 0, kind: input, shape index: {}]   ;;  %s262_s1 = inlined_call_operand.hbm [shape: f32[16,128], index: 1, kind: input, shape index: {}]   ;;  %s263_s2 = inlined_call_operand.hbm [shape: f32[1,1], index: 2, kind: output, shape index: {}]  }
   0x1   :  { %8 = vsyncpa [#allocation7], 0 }
   0x2   :  { %9 = vsyncpa [#allocation5], 0  ;;  %s205_s9 = smov [#allocation3]   ;;  %s133_s13 = scalar_lea.hbm %s261_s0, 256 }
   0x3   :  { %s21_s10 = sshll.u32 %s205_s9, 4  ;;  %p134_p0 = scmp.ne.s32.totalorder %s261_s0, %s133_s13  ;;  %s22_s10 = int_to_ptr.vmem [resolvable:$true] %s21_s10 }
   0x4   :  { %p137_p1 = scmp.lt.u32.totalorder %s133_s13, %s261_s0 }
   0x6   :  { %p139_p2 = pnand %p137_p1, %p134_p0 }
   0x8   :  { %142 = shalt.err (!%p139_p2)
}
   0x9   :  { %s143_s18 = scalar_lea.vmem %s22_s10, 256  ;;  %p148_p4 = scmp.lt.s32.totalorder %s22_s10, %s22_s10 }
   0xa   :  { %p144_p3 = scmp.ne.s32.totalorder %s22_s10, %s143_s18  ;;  %p149_p5 = scmp.lt.s32.totalorder %s143_s18, %s143_s18 }
   0xc   :  { %p150_p6 = por %p149_p5, %p148_p4 }
   0xe   :  { %p151_p7 = pnand %p150_p6, %p144_p3 }
  0x10   :  { %154 = shalt.err (!%p151_p7)
}
  0x11   :  { %s206_s19 = smov 128   ;;  %s207_s20 = smov 8  }
  0x12   :  { %27 = dma.hbm_to_vmem [thread:$0]  %s261_s0, 256, %s22_s10, [#allocation4], %s206_s19, %s206_s19, %s207_s20  }
  0x13   :  { %s208_s23 = smov [#allocation6]   ;;  %s155_s27 = scalar_lea.hbm %s262_s1, 256 }
  0x14   :  { %s39_s24 = sshll.u32 %s208_s23, 4  ;;  %p156_p8 = scmp.ne.s32.totalorder %s262_s1, %s155_s27  ;;  %s40_s24 = int_to_ptr.vmem [resolvable:$true] %s39_s24 }
  0x15   :  { %p159_p9 = scmp.lt.u32.totalorder %s155_s27, %s262_s1 }
  0x17   :  { %p161_p10 = pnand %p159_p9, %p156_p8 }
  0x19   :  { %164 = shalt.err (!%p161_p10)
}
  0x1a   :  { %s165_s4 = scalar_lea.vmem %s40_s24, 256  ;;  %p170_p12 = scmp.lt.s32.totalorder %s40_s24, %s40_s24 }
  0x1b   :  { %p166_p11 = scmp.ne.s32.totalorder %s40_s24, %s165_s4  ;;  %p171_p13 = scmp.lt.s32.totalorder %s165_s4, %s165_s4 }
  0x1d   :  { %p172_p0 = por %p171_p13, %p170_p12 }
  0x1f   :  { %p173_p1 = pnand %p172_p0, %p166_p11 }
  0x21   :  { %176 = shalt.err (!%p173_p1)
}
  0x22   :  { %45 = dma.hbm_to_vmem [thread:$0]  %s262_s1, 256, %s40_s24, [#allocation7], %s206_s19, %s206_s19, %s207_s20  }
  0x23   :  { %199 = dma.done.wait [#allocation4], 256  }
  0x24   :  { %200 = vsyncadd [#allocation4], 4294967040 }
  0x25   :  { %201 = dma.done.wait [#allocation7], 256  }
  0x26   :  { %202 = vsyncadd [#allocation7], 4294967040  ;;  %v66_v0 = vld [vmem:[#allocation3] sm:$0xff]  ;;  %v67_v1 = vld [vmem:[#allocation3 + $0x8] sm:$0xff]  ;;  %s209_s1 = smov [#allocation8]   ;;  %vm104_vm0 = vcmask 0  }
  0x27   :  { %v68_v2 = vld [vmem:[#allocation6] sm:$0xff]  ;;  %v69_v3 = vld [vmem:[#allocation6 + $0x8] sm:$0xff]  ;;  %s112_s6 = sshll.u32 %s209_s1, 4  ;;  %s113_s6 = int_to_ptr.vmem [resolvable:$true] %s112_s6 }
  0x28   :  { %v70_v4 = vsub.f32 %v66_v0, %v68_v2  ;;  %v71_v5 = vsub.f32 %v67_v1, %v69_v3  ;;  %s177_s8 = scalar_lea.vmem %s113_s6, 16  ;;  %s181_s9 = scalar_lea.vmem %s113_s6, 32 }
  0x29   :  { %p178_p2 = scmp.ne.s32.totalorder %s113_s6, %s177_s8  ;;  %p182_p3 = scmp.lt.s32.totalorder %s113_s6, %s113_s6 }
  0x2a   :  { %v72_v6 = vmul.f32 %v70_v4, %v70_v4  ;;  %v73_v7 = vmul.f32 %v71_v5, %v71_v5  ;;  %p183_p4 = scmp.lt.s32.totalorder %s181_s9, %s177_s8 }
  0x2c   :  { %v74_v8 = vmul.f32 %v72_v6, %v72_v6  ;;  %v75_v9 = vmul.f32 %v73_v7, %v73_v7  ;;  %p184_p5 = por %p183_p4, %p182_p3 }
  0x2e   :  { %v76_v10 = vmul.f32 %v74_v8, %v74_v8  ;;  %v77_v11 = vmul.f32 %v75_v9, %v75_v9  ;;  %p185_p6 = pnand %p184_p5, %p178_p2 }
  0x30   :  { %v78_v12 = vmul.f32 %v76_v10, %v72_v6  ;;  %v79_v13 = vmul.f32 %v77_v11, %v73_v7 }
  0x32   :  { %v93_v14 = vadd.f32 %v79_v13, %v78_v12 }
  0x34   :  { %94 = vadd.xlane.f32.xlu0 %v93_v14 }
  0xc1   :  { %v95_v15 = vpop.xlane.xlu0 %94 }
  0xc2   :  { %v96_v16 = vrot.slane %v95_v15, 4 }
  0xc4   :  { %v97_v17 = vadd.f32 %v96_v16, %v95_v15 }
  0xc6   :  { %v98_v18 = vrot.slane %v97_v17, 2 }
  0xc8   :  { %v99_v19 = vadd.f32 %v98_v18, %v97_v17 }
  0xca   :  { %v100_v20 = vrot.slane %v99_v19, 1 }
  0xcc   :  { %v101_v21 = vadd.f32 %v100_v20, %v99_v19 }
  0xce   :  { %126 = vpush %v101_v21 }
  0xff   :  { %s127_s7 = spop %126 }
 0x100   :  { %v103_v22 = vstv %s127_s7 }
 0x101   :  { %105 = vst.msk [vmem:[#allocation8] sm:$0x1] %vm104_vm0, %v103_v22 }
 0x102   :  { %188 = shalt.err (!%p185_p6)
}
 0x103   :  { %s189_s12 = scalar_lea.hbm %s263_s2, 16 }
 0x104   :  { %p190_p7 = scmp.ne.s32.totalorder %s263_s2, %s189_s12  ;;  %p193_p8 = scmp.lt.u32.totalorder %s189_s12, %s263_s2 }
 0x106   :  { %p195_p9 = pnand %p193_p8, %p190_p7 }
 0x108   :  { %198 = shalt.err (!%p195_p9)
}
 0x109   :  { %115 = dma.vmem_to_hbm [thread:$0]  %s113_s6, 16, %s263_s2, [#allocation5]  }
 0x10a   :  { %203 = dma.done.wait [#allocation5], 16  }
 0x10b   :  { %204 = vsyncadd [#allocation5], 4294967280 }
 0x10c   :  { %119 = vsyncpa [#allocation4], 1 }
 0x10d   :  { %120 = vsyncpa [#allocation7], 1 }
 0x10e   :  { %121 = vsyncpa [#allocation5], 1 }

</bundles_post_ra>
